<compile_context>
chip_gen: v5e
topology: v5e:2x2
jax: 0.10.0
libtpu: 0.0.40
codegen_flags: <defaults>
</compile_context>

<pallas_src>
import functools

import jax
import jax.numpy as jnp
from jax.experimental import pallas as pl
from jax.experimental.pallas import tpu as pltpu


def _round_up(x, m):
    return ((x + m - 1) // m) * m


def _epilogue_dtype():
    """bf16 epilogues on chips with a bf16 VPU (v6e/v7x); f32 on v5e/unknown."""
    try:
        kind = jax.devices()[0].device_kind.lower()
    except Exception:
        return jnp.float32
    if "v5 lite" in kind or "v5e" in kind or "v5lite" in kind:
        return jnp.float32
    return jnp.bfloat16


def _critic_kernel(x_ref, w1_ref, b1_ref, w2_ref, b2_ref, w3_ref, b3_ref, o_ref,
                   *, ep_dtype):
    mxu = jnp.bfloat16
    # Layer 1: Linear(in_dim -> hid) + ReLU.  In-kernel bf16 casts for the MXU
    # operands; f32 accumulation; bias-add + ReLU in ep_dtype.
    x = x_ref[...].astype(mxu)
    h1 = jnp.dot(x, w1_ref[...].astype(mxu), preferred_element_type=jnp.float32)
    h1 = jnp.maximum((h1 + b1_ref[...]).astype(ep_dtype), 0).astype(mxu)
    # Layer 2: Linear(hid -> hid) + ReLU.
    h2 = jnp.dot(h1, w2_ref[...].astype(mxu), preferred_element_type=jnp.float32)
    h2 = jnp.maximum((h2 + b2_ref[...]).astype(ep_dtype), 0)
    # Layer 3: Linear(hid -> 1) as a VPU multiply + cross-lane reduce (XLU);
    # w3 stays f32, product/accumulation in f32.
    v = jnp.sum(h2 * w3_ref[...], axis=-1)                    # (tile_b,) f32
    # Lane-dense store: one (1, tile_b) row instead of a (tile_b, 1) column.
    o_ref[...] = (v[None, :] + b3_ref[...]).astype(o_ref.dtype)


def _choose_tile_b(B, in_dim, hid, *, vmem_budget_bytes=20 * 1024 * 1024,
                   min_tiles=8, tile_floor=1024):
    """Batch tile from a per-row VMEM formula, clamped for megacore splitting."""
    # Per-row working set:
    #   x block (double-buffered f32) : 2 * 4 * in_dim
    #   x bf16 cast                   : 2 * in_dim
    #   h1, h2 (f32 acc + bf16 op)    : 2 * (4 + 2) * hid
    #   out row (double-buffered f32) : 2 * 4
    bytes_per_row = 10 * in_dim + 12 * hid + 8
    vmem_tile = max(128, (vmem_budget_bytes // bytes_per_row) // 128 * 128)
    # Aim for >= min_tiles grid steps (so v7x can shard the batch across both
    # TensorCores) while keeping tiles big enough to amortize the ~0.35us
    # per-grid-step overhead.
    split_tile = _round_up(pl.cdiv(B, min_tiles), 128)
    tile_b = min(vmem_tile, max(split_tile, tile_floor))
    if B <= tile_b:
        return B              # single full-extent block (always legal)
    return tile_b


def critic_forward(x, params):
    """x: [B, in_dim] float32 -> values: [B] float32 (matches net(x).squeeze(-1))."""
    w1, b1, w2, b2, w3, b3 = params
    B, in_dim = x.shape
    hid = w1.shape[1]
    ep_dtype = _epilogue_dtype()

    # No per-call data-plane casts; only a 64-element reshape of w3 to a
    # (1, hid) row for the layer-3 VPU/XLU reduce (negligible, not B-sized).
    w3_row = w3.reshape(1, hid)
    b3_2d = b3.reshape(1, 1)

    tile_b = _choose_tile_b(B, in_dim, hid)
    grid = (pl.cdiv(B, tile_b),)
    const = lambda i: (0, 0)   # weights/biases resident across the whole grid

    flops = 2 * B * (in_dim * hid + hid * hid + hid)
    bytes_accessed = int(
        B * in_dim * x.dtype.itemsize                     # x read (native dtype)
        + B * 4                                           # output write
        + sum(a.size * a.dtype.itemsize
              for a in (w1, b1, w2, b2, w3_row, b3_2d)))  # params read once

    out = pl.pallas_call(
        functools.partial(_critic_kernel, ep_dtype=ep_dtype),
        out_shape=jax.ShapeDtypeStruct((1, B), jnp.float32),
        grid=grid,
        in_specs=[
            pl.BlockSpec((tile_b, in_dim), lambda i: (i, 0)),   # x, streamed
            pl.BlockSpec(w1.shape, const),
            pl.BlockSpec(b1.shape, const),
            pl.BlockSpec(w2.shape, const),
            pl.BlockSpec(b2.shape, const),
            pl.BlockSpec(w3_row.shape, const),
            pl.BlockSpec(b3_2d.shape, const),
        ],
        out_specs=pl.BlockSpec((1, tile_b), lambda i: (0, i)),  # lane-dense row
        compiler_params=pltpu.CompilerParams(
            dimension_semantics=("parallel",),       # megacore on v7x
            vmem_limit_bytes=40 * 1024 * 1024,       # <= ~48 MiB: v7x-safe
        ),
        cost_estimate=pl.CostEstimate(
            flops=flops, transcendentals=0, bytes_accessed=bytes_accessed),
    )(x, w1, b1, w2, b2, w3_row, b3_2d)
    return out[0]  # (B,), matches .squeeze(-1)


def xavier_uniform(key, fan_in, fan_out, dtype=jnp.float32):
    bound = jnp.sqrt(6.0 / (fan_in + fan_out)).astype(dtype)
    return jax.random.uniform(key, (fan_in, fan_out), dtype, -bound, bound)


def linear_bias(key, fan_in, fan_out, dtype=jnp.float32):
    # PyTorch nn.Linear default bias init: U(-1/sqrt(fan_in), 1/sqrt(fan_in)).
    bound = 1.0 / jnp.sqrt(jnp.asarray(fan_in, dtype))
    return jax.random.uniform(key, (1, fan_out), dtype, -bound, bound)


def init_critic_params(key, in_dim, hid=64):
    k = jax.random.split(key, 6)
    w1 = xavier_uniform(k[0], in_dim, hid)
    b1 = linear_bias(k[1], in_dim, hid)
    w2 = xavier_uniform(k[2], hid, hid)
    b2 = linear_bias(k[3], hid, hid)
    w3 = xavier_uniform(k[4], hid, 1)
    b3 = linear_bias(k[5], hid, 1)
    return (w1, b1, w2, b2, w3, b3)


if __name__ == "__main__":
    key = jax.random.PRNGKey(0)
    k_x, k_p = jax.random.split(key)

    B, in_dim, hid = 32, 16, 64  # small shapes consistent with the module
    x = jax.random.normal(k_x, (B, in_dim), dtype=jnp.float32)
    params = init_critic_params(k_p, in_dim, hid)

    values = critic_forward(x, params)
    jax.block_until_ready(values)

    # Reference in plain JAX, mirroring the kernel's in-kernel bf16 MXU
    # operands and epilogue dtype so only accumulation-order noise remains.
    w1, b1, w2, b2, w3, b3 = params
    ep = _epilogue_dtype()
    bf = lambda a: a.astype(jnp.bfloat16)
    h1 = jnp.maximum((jnp.dot(bf(x), bf(w1), preferred_element_type=jnp.float32)
                      + b1).astype(ep), 0).astype(jnp.bfloat16)
    h2 = jnp.maximum((jnp.dot(h1, bf(w2), preferred_element_type=jnp.float32)
                      + b2).astype(ep), 0)
    ref = jnp.sum(h2 * w3.reshape(1, hid), axis=-1) + b3.reshape(())

    assert values.shape == (B,)
    assert jnp.allclose(values, ref, atol=1e-2, rtol=1e-2), (
        float(jnp.max(jnp.abs(values - ref))))

    print("KERNEL_OK")
</pallas_src>

<mosaic_0001>
module attributes {stable_mosaic.version = 11 : i64} {
  func.func @_critic_kernel(%arg0: i32, %arg1: memref<32x16xf32, #tpu.memory_space<vmem>>, %arg2: memref<16x64xf32, #tpu.memory_space<vmem>>, %arg3: memref<1x64xf32, #tpu.memory_space<vmem>>, %arg4: memref<64x64xf32, #tpu.memory_space<vmem>>, %arg5: memref<1x64xf32, #tpu.memory_space<vmem>>, %arg6: memref<1x64xf32, #tpu.memory_space<vmem>>, %arg7: memref<1x1xf32, #tpu.memory_space<vmem>>, %arg8: memref<1x32xf32, #tpu.memory_space<vmem>>) attributes {dimension_semantics = [#tpu.dimension_semantics<parallel>], iteration_bounds = array<i64: 1>, scalar_prefetch = 0 : i64, scratch_operands = 0 : i64, tpu.core_type = #tpu.core_type<tc>, window_params = [{transform_indices = @transform_0, window_bounds = array<i64: 32, 16>}, {pipeline_mode = #tpu.pipeline_mode<synchronous>, transform_indices = @transform_1, window_bounds = array<i64: 16, 64>}, {pipeline_mode = #tpu.pipeline_mode<synchronous>, transform_indices = @transform_2, window_bounds = array<i64: 1, 64>}, {pipeline_mode = #tpu.pipeline_mode<synchronous>, transform_indices = @transform_3, window_bounds = array<i64: 64, 64>}, {pipeline_mode = #tpu.pipeline_mode<synchronous>, transform_indices = @transform_4, window_bounds = array<i64: 1, 64>}, {pipeline_mode = #tpu.pipeline_mode<synchronous>, transform_indices = @transform_5, window_bounds = array<i64: 1, 64>}, {pipeline_mode = #tpu.pipeline_mode<synchronous>, transform_indices = @transform_6, window_bounds = array<i64: 1, 1>}, {transform_indices = @transform_7, window_bounds = array<i64: 1, 32>}]} {
    %c0 = arith.constant 0 : index
    %c0_0 = arith.constant 0 : index
    %0 = vector.load %arg1[%c0, %c0_0] : memref<32x16xf32, #tpu.memory_space<vmem>>, vector<32x16xf32>
    %1 = arith.truncf %0 : vector<32x16xf32> to vector<32x16xbf16>
    %c0_1 = arith.constant 0 : index
    %c0_2 = arith.constant 0 : index
    %2 = vector.load %arg2[%c0_1, %c0_2] : memref<16x64xf32, #tpu.memory_space<vmem>>, vector<16x64xf32>
    %3 = arith.truncf %2 : vector<16x64xf32> to vector<16x64xbf16>
    %cst = arith.constant dense<0.000000e+00> : vector<32x64xf32>
    %4 = tpu.matmul %1, %3, %cst {dimension_numbers = #tpu.dot_dimension_numbers<[1], [0], [0], [1], [0, 0, 1, 1], [], []>} : vector<32x16xbf16>, vector<16x64xbf16>, vector<32x64xf32> -> vector<32x64xf32>
    %c0_3 = arith.constant 0 : index
    %c0_4 = arith.constant 0 : index
    %5 = vector.load %arg3[%c0_3, %c0_4] : memref<1x64xf32, #tpu.memory_space<vmem>>, vector<1x64xf32>
    %6 = vector.broadcast %5 : vector<1x64xf32> to vector<32x64xf32>
    %7 = arith.addf %4, %6 : vector<32x64xf32>
    %8 = arith.truncf %7 : vector<32x64xf32> to vector<32x64xbf16>
    %cst_5 = arith.constant 0.000000e+00 : bf16
    %9 = vector.broadcast %cst_5 : bf16 to vector<32x64xbf16>
    %10 = arith.maximumf %8, %9 : vector<32x64xbf16>
    %c0_6 = arith.constant 0 : index
    %c0_7 = arith.constant 0 : index
    %11 = vector.load %arg4[%c0_6, %c0_7] : memref<64x64xf32, #tpu.memory_space<vmem>>, vector<64x64xf32>
    %12 = arith.truncf %11 : vector<64x64xf32> to vector<64x64xbf16>
    %cst_8 = arith.constant dense<0.000000e+00> : vector<32x64xf32>
    %13 = tpu.matmul %10, %12, %cst_8 {dimension_numbers = #tpu.dot_dimension_numbers<[1], [0], [0], [1], [0, 0, 1, 1], [], []>} : vector<32x64xbf16>, vector<64x64xbf16>, vector<32x64xf32> -> vector<32x64xf32>
    %c0_9 = arith.constant 0 : index
    %c0_10 = arith.constant 0 : index
    %14 = vector.load %arg5[%c0_9, %c0_10] : memref<1x64xf32, #tpu.memory_space<vmem>>, vector<1x64xf32>
    %15 = vector.broadcast %14 : vector<1x64xf32> to vector<32x64xf32>
    %16 = arith.addf %13, %15 : vector<32x64xf32>
    %17 = arith.truncf %16 : vector<32x64xf32> to vector<32x64xbf16>
    %cst_11 = arith.constant 0.000000e+00 : bf16
    %18 = vector.broadcast %cst_11 : bf16 to vector<32x64xbf16>
    %19 = arith.maximumf %17, %18 : vector<32x64xbf16>
    %c0_12 = arith.constant 0 : index
    %c0_13 = arith.constant 0 : index
    %20 = vector.load %arg6[%c0_12, %c0_13] : memref<1x64xf32, #tpu.memory_space<vmem>>, vector<1x64xf32>
    %21 = arith.extf %19 : vector<32x64xbf16> to vector<32x64xf32>
    %22 = vector.broadcast %20 : vector<1x64xf32> to vector<32x64xf32>
    %23 = arith.mulf %21, %22 : vector<32x64xf32>
    %cst_14 = arith.constant dense<0.000000e+00> : vector<32xf32>
    %24 = vector.multi_reduction <add>, %23, %cst_14 [1] : vector<32x64xf32> to vector<32xf32>
    %25 = vector.shape_cast %24 : vector<32xf32> to vector<1x32xf32>
    %c0_15 = arith.constant 0 : index
    %c0_16 = arith.constant 0 : index
    %26 = vector.load %arg7[%c0_15, %c0_16] : memref<1x1xf32, #tpu.memory_space<vmem>>, vector<1x1xf32>
    %27 = vector.broadcast %26 : vector<1x1xf32> to vector<1x32xf32>
    %28 = arith.addf %25, %27 : vector<1x32xf32>
    %c0_17 = arith.constant 0 : index
    %c0_18 = arith.constant 0 : index
    %29 = vector.load %arg8[%c0_17, %c0_18] : memref<1x32xf32, #tpu.memory_space<vmem>>, vector<1x32xf32>
    tpu.vector_store %arg8[%c0_17, %c0_18], %28 {strides = array<i32>} : memref<1x32xf32, #tpu.memory_space<vmem>>, vector<1x32xf32>,
    return
  }
  func.func @transform_0(%arg0: i32) -> (i32, i32) {
    %c0_i32 = arith.constant 0 : i32
    %c0_i32_0 = arith.constant 0 : i32
    return %arg0, %c0_i32 : i32, i32
  }
  func.func @transform_1(%arg0: i32) -> (i32, i32) {
    %c0_i32 = arith.constant 0 : i32
    %c0_i32_0 = arith.constant 0 : i32
    %c0_i32_1 = arith.constant 0 : i32
    return %c0_i32, %c0_i32_0 : i32, i32
  }
  func.func @transform_2(%arg0: i32) -> (i32, i32) {
    %c0_i32 = arith.constant 0 : i32
    %c0_i32_0 = arith.constant 0 : i32
    %c0_i32_1 = arith.constant 0 : i32
    return %c0_i32, %c0_i32_0 : i32, i32
  }
  func.func @transform_3(%arg0: i32) -> (i32, i32) {
    %c0_i32 = arith.constant 0 : i32
    %c0_i32_0 = arith.constant 0 : i32
    %c0_i32_1 = arith.constant 0 : i32
    return %c0_i32, %c0_i32_0 : i32, i32
  }
  func.func @transform_4(%arg0: i32) -> (i32, i32) {
    %c0_i32 = arith.constant 0 : i32
    %c0_i32_0 = arith.constant 0 : i32
    %c0_i32_1 = arith.constant 0 : i32
    return %c0_i32, %c0_i32_0 : i32, i32
  }
  func.func @transform_5(%arg0: i32) -> (i32, i32) {
    %c0_i32 = arith.constant 0 : i32
    %c0_i32_0 = arith.constant 0 : i32
    %c0_i32_1 = arith.constant 0 : i32
    return %c0_i32, %c0_i32_0 : i32, i32
  }
  func.func @transform_6(%arg0: i32) -> (i32, i32) {
    %c0_i32 = arith.constant 0 : i32
    %c0_i32_0 = arith.constant 0 : i32
    %c0_i32_1 = arith.constant 0 : i32
    return %c0_i32, %c0_i32_0 : i32, i32
  }
  func.func @transform_7(%arg0: i32) -> (i32, i32) {
    %c0_i32 = arith.constant 0 : i32
    %c0_i32_0 = arith.constant 0 : i32
    return %c0_i32, %arg0 : i32, i32
  }
}

</mosaic_0001>

<bundles_post_ra>
// kernel: tpu_custom_call.1
= control target key start
LH: loop header
LB: loop body
LE: loop exit
PB: predicated region body
PF: predicated region fallthrough
CT: control target
= control target key end

     0   :  { %s388_s0 = inlined_call_operand.vmem [shape: f32[32,16], index: 0, kind: input, shape index: {}]   ;;  %s389_s1 = inlined_call_operand.vmem [shape: f32[16,64], index: 1, kind: input, shape index: {}]   ;;  %s390_s2 = inlined_call_operand.vmem [shape: f32[1,64], index: 2, kind: input, shape index: {}]   ;;  %s391_s3 = inlined_call_operand.hbm [shape: f32[64,64], index: 3, kind: input, shape index: {}]   ;;  %s392_s4 = inlined_call_operand.vmem [shape: f32[1,64], index: 4, kind: input, shape index: {}]   ;;  %s393_s5 = inlined_call_operand.vmem [shape: f32[1,64], index: 5, kind: input, shape index: {}]   ;;  %s394_s6 = inlined_call_operand.<no memory space> [shape: f32[1,1], index: 6, kind: input, shape index: {}]   ;;  %s395_s7 = inlined_call_operand.hbm [shape: f32[1,32], index: 7, kind: output, shape index: {}]  }
   0x1   :  { %v12_v0 = vstv %s394_s6 }
   0x2   :  { %13 = vst [vmem:[#allocation2] sm:$0x1] %v12_v0 }
   0x3   :  { %14 = vsyncpa [#allocation4], 0 }
   0x4   :  { %15 = vsyncpa [#allocation5], 0  ;;  %s26_s28 = sshll.u32 %s391_s3, 4  ;;  %s301_s29 = smov [#allocation3]   ;;  %s27_s28 = int_to_ptr.hbm [resolvable:$true] %s26_s28 }
   0x5   :  { %s28_s30 = sshll.u32 %s301_s29, 4  ;;  %s302_s8 = smov 128   ;;  %s29_s30 = int_to_ptr.vmem [resolvable:$true] %s28_s30 }
   0x6   :  { %s303_s9 = smov 8  }
   0x7   :  { %34 = dma.hbm_to_vmem [thread:$0]  %s27_s28, 1024, %s29_s30, [#allocation4], %s302_s8, %s302_s8, %s303_s9  }
   0x8   :  { %297 = dma.done.wait [#allocation4], 1024  }
   0x9   :  { %298 = vsyncadd [#allocation4], 4294966272  ;;  %v52_v1 = vld [vmem:[%s389_s1] sm:$0xff]  ;;  %v53_v2 = vld [vmem:[%s389_s1 + $0x8] sm:$0xff]  ;;  %vm59_vm0 = vcmask 130048   ;;  %v304_v23 = vmov 0  }
   0xa   :  { %v46_v3 = vld [vmem:[%s388_s0] sm:$0xff]  ;;  %v54_v4 = vpack.c.bf16 %v53_v2, %v52_v1  ;;  %v47_v5 = vld [vmem:[%s388_s0 + $0x8] sm:$0xff]  ;;  %v48_v6 = vld [vmem:[%s388_s0 + $0x10] sm:$0xff]  ;;  %245 = vset.pattern.permute.xlu0 %v304_v23  ;;  %vm115_vm1 = vcmask 523264   ;;  %vm201_vm2 = vcmask 130112   ;;  %vm205_vm3 = vcmask 195712  }
   0xb   :  { %v49_v7 = vld [vmem:[%s388_s0 + $0x18] sm:$0xff]  ;;  %v50_v8 = vpack.c.bf16 %v47_v5, %v46_v3  ;;  %v103_v13 = vld [vmem:[#allocation3 + $0x20] sm:$0xff]  ;;  %v104_v14 = vld [vmem:[#allocation3 + $0x28] sm:$0xff]  ;;  %s221_s25 = sshll.u32 %s395_s7, 4  ;;  %vm209_vm4 = vcmask 261312   ;;  %vm212_vm5 = vcmask 253952   ;;  %s222_s25 = int_to_ptr.hbm [resolvable:$true] %s221_s25 }
   0xc   :  { %v51_v9 = vpack.c.bf16 %v49_v7, %v48_v6  ;;  %73 = vmatpush.bf16.msra.mxu0 %v54_v4  ;;  %235 = vmatpush.bf16.msra.mxu3 %v54_v4  ;;  %v105_v10 = vld [vmem:[#allocation3 + $0x30] sm:$0xff]  ;;  %v106_v11 = vld [vmem:[#allocation3 + $0x38] sm:$0xff]  ;;  %v109_v15 = vpack.c.bf16 %v104_v14, %v103_v13  ;;  %v99_v19 = vld [vmem:[#allocation3] sm:$0xff]  ;;  %v196_v7 = vlaneseq }
   0xd   :  { %v110_v12 = vpack.c.bf16 %v106_v11, %v105_v10  ;;  %v101_v16 = vld [vmem:[#allocation3 + $0x10] sm:$0xff]  ;;  %v102_v17 = vld [vmem:[#allocation3 + $0x18] sm:$0xff]  ;;  %v100_v20 = vld [vmem:[#allocation3 + $0x8] sm:$0xff] }
   0xe   :  { %v108_v18 = vpack.c.bf16 %v102_v17, %v101_v16  ;;  %v107_v21 = vpack.c.bf16 %v100_v20, %v99_v19  ;;  %v181_v22 = vld [vmem:[#allocation2] sm:$0x1] }
   0xf   :  { %231 = vmatmul.msk.bf16.vlgmr.msra.gmra.mxu0 %vm59_vm0, %v50_v8  ;;  %232 = vmatmul.msk.bf16.vlgmr.msra.gmra.mxu3 %vm59_vm0, %v51_v9  ;;  %v246_v25 = vld [vmem:[%s390_s2] ss:$0 sm:$0xff]  ;;  %v197_v9 = vand.u32 127, %v196_v7 }
  0x10   :  { %126 = vmatpush.bf16.msra.mxu1 %v110_v12  ;;  %236 = vmatpush.bf16.msra.mxu2 %v110_v12  ;;  %v247_v39 = vld [vmem:[%s392_s4] ss:$0 sm:$0xff]  ;;  %s305_s4 = smov [#allocation6]  }
  0x11   :  { %184 = vperm.xlu0 %245, %v181_v22   ;;  %v248_v44 = vld [vmem:[%s393_s5] ss:$0 sm:$0xff]  ;;  %v199_v11 = vadd.s32 4294967288, %v197_v9  ;;  %v203_v13 = vadd.s32 4294967280, %v197_v9  ;;  %s219_s5 = sshll.u32 %s305_s4, 4  ;;  %s220_s5 = int_to_ptr.vmem [resolvable:$true] %s219_s5 }
  0x14   :  { %127 = vmatpush.bf16.msra.mxu1 %v109_v15  ;;  %237 = vmatpush.bf16.msra.mxu2 %v109_v15 }
  0x18   :  { %128 = vmatpush.bf16.msra.mxu1 %v108_v18  ;;  %238 = vmatpush.bf16.msra.mxu2 %v108_v18  ;;  %v207_v18 = vadd.s32 4294967272, %v197_v9 }
  0x1c   :  { %129 = vmatpush.bf16.msra.mxu1 %v107_v21  ;;  %239 = vmatpush.bf16.msra.mxu2 %v107_v21 }
  0x83   :  { %v185_v5 = vpop.permute.xlu0 %184 }
  0x84   :  { %v187_v8 = vperm.slane %v185_v5, 0 }
  0x8c   :  { %v75_v24 = vpop.f32.mrf.mxu0 }
  0x8d   :  { %v76_v27 = vadd.f32 %v246_v25, %v75_v24 }
  0x8f   :  { %v93_v30 = vmax.f32 %v76_v27, 0.0 }
  0x92   :  { %v80_v26 = vpop.f32.mrf.mxu3 }
  0x93   :  { %v81_v32 = vadd.f32 %v246_v25, %v80_v26 }
  0x94   :  { %v77_v28 = vpop.f32.mrf.mxu0 }
  0x95   :  { %v78_v29 = vadd.f32 %v246_v25, %v77_v28  ;;  %v95_v36 = vmax.f32 %v81_v32, 0.0 }
  0x97   :  { %v94_v31 = vmax.f32 %v78_v29, 0.0 }
  0x99   :  { %v97_v33 = vpack.c.bf16 %v94_v31, %v93_v30 }
  0x9a   :  { %v82_v34 = vpop.f32.mrf.mxu3 }
  0x9b   :  { %v83_v35 = vadd.f32 %v246_v25, %v82_v34  ;;  %233 = vmatmul.msk.bf16.vlgmr.msra.gmra.mxu1 %vm115_vm1, %v97_v33 }
  0x9d   :  { %v96_v37 = vmax.f32 %v83_v35, 0.0 }
  0x9f   :  { %v98_v38 = vpack.c.bf16 %v96_v37, %v95_v36 }
  0xa1   :  { %234 = vmatmul.msk.bf16.vlgmr.msra.gmra.mxu2 %vm115_vm1, %v98_v38 }
 0x118   :  { %v131_v40 = vpop.f32.mrf.mxu1 }
 0x119   :  { %v132_v41 = vadd.f32 %v247_v39, %v131_v40 }
 0x11b   :  { %v149_v42 = vmax.f32 %v132_v41, 0.0 }
 0x11d   :  { %v153_v43 = vpack.c.bf16 %v149_v42, %v149_v42 }
 0x11f   :  { %v158_v45 = vunpack.c.l.bf16 %v153_v43 }
 0x120   :  { %v133_v46 = vpop.f32.mrf.mxu1 }
 0x121   :  { %v134_v47 = vadd.f32 %v247_v39, %v133_v46  ;;  %v165_v48 = vmul.f32 %v248_v44, %v158_v45 }
 0x123   :  { %v150_v49 = vmax.f32 %v134_v47, 0.0  ;;  %v169_v50 = vsel %vm115_vm1, %v165_v48, 0.0 }
 0x124   :  { %v136_v51 = vpop.f32.mrf.mxu2  ;;  %170 = vadd.xlane.f32.xlu0 %v169_v50 }
 0x125   :  { %v154_v52 = vpack.c.bf16 %v150_v49, %v150_v49  ;;  %v137_v53 = vadd.f32 %v247_v39, %v136_v51 }
 0x127   :  { %v159_v54 = vunpack.c.l.bf16 %v154_v52  ;;  %v151_v55 = vmax.f32 %v137_v53, 0.0 }
 0x129   :  { %v155_v56 = vpack.c.bf16 %v151_v55, %v151_v55  ;;  %v166_v57 = vmul.f32 %v248_v44, %v159_v54 }
 0x12b   :  { %v160_v58 = vunpack.c.l.bf16 %v155_v56  ;;  %v172_v59 = vsel %vm115_vm1, %v166_v57, 0.0 }
 0x12c   :  { %v138_v60 = vpop.f32.mrf.mxu2  ;;  %173 = vadd.xlane.f32.xlu1 %v172_v59 }
 0x12d   :  { %v139_v61 = vadd.f32 %v247_v39, %v138_v60  ;;  %v167_v63 = vmul.f32 %v248_v44, %v160_v58 }
 0x12f   :  { %v152_v62 = vmax.f32 %v139_v61, 0.0  ;;  %v175_v2 = vsel %vm115_vm1, %v167_v63, 0.0 }
 0x131   :  { %v156_v0 = vpack.c.bf16 %v152_v62, %v152_v62 }
 0x133   :  { %v161_v1 = vunpack.c.l.bf16 %v156_v0 }
 0x134   :  { %176 = vadd.xlane.f32.xlu1 %v175_v2 }
 0x135   :  { %v168_v3 = vmul.f32 %v248_v44, %v161_v1 }
 0x137   :  { %v178_v4 = vsel %vm115_vm1, %v168_v3, 0.0 }
 0x138   :  { %179 = vadd.xlane.f32.xlu2 %v178_v4 }
 0x197   :  { %v171_v10 = vpop.xlane.xlu0 %170 }
 0x198   :  { %v188_v15 = vadd.f32 %v187_v8, %v171_v10 }
 0x19a   :  { %v198_v21 = vperm.slane %v188_v15, %v197_v9 }
 0x19f   :  { %v174_v6 = vpop.xlane.xlu1 %173 }
 0x1a0   :  { %v189_v12 = vadd.f32 %v187_v8, %v174_v6 }
 0x1a2   :  { %v200_v17 = vperm.slane %v189_v12, %v199_v11 }
 0x1a4   :  { %v202_v23 = vsel %vm201_vm2, %v200_v17, %v198_v21 }
 0x1a7   :  { %v177_v14 = vpop.xlane.xlu1 %176 }
 0x1a8   :  { %v190_v16 = vadd.f32 %v187_v8, %v177_v14 }
 0x1aa   :  { %v204_v19 = vperm.slane %v190_v16, %v203_v13 }
 0x1ab   :  { %v180_v20 = vpop.xlane.xlu2 %179 }
 0x1ac   :  { %v191_v22 = vadd.f32 %v187_v8, %v180_v20  ;;  %v206_v25 = vsel %vm205_vm3, %v204_v19, %v202_v23 }
 0x1ae   :  { %v208_v24 = vperm.slane %v191_v22, %v207_v18 }
 0x1b0   :  { %v210_v26 = vsel %vm209_vm4, %v208_v24, %v206_v25 }
 0x1b1   :  { %213 = vst.msk [vmem:[#allocation6] sm:$0x1] %vm212_vm5, %v210_v26 }
 0x1b2   :  { %224 = dma.vmem_to_hbm [thread:$0]  %s220_s5, 16, %s222_s25, [#allocation5]  }
 0x1b3   :  { %299 = dma.done.wait [#allocation5], 16  }
 0x1b4   :  { %300 = vsyncadd [#allocation5], 4294967280 }
 0x1b5   :  { %229 = vsyncpa [#allocation4], 1 }
 0x1b6   :  { %230 = vsyncpa [#allocation5], 1 }

</bundles_post_ra>
